<compile_context>
chip_gen: v6e
topology: v6e:2x2x1
jax: 0.10.0
libtpu: 0.0.40
codegen_flags: <defaults>
</compile_context>

<pallas_src>
import jax
import jax.numpy as jnp
from jax.experimental import pallas as pl
from jax.experimental.pallas import tpu as pltpu


def _mean_all(v, count):
    """Mean over a 2-D (sublane, lane) tile via two single-axis reduces."""
    s = jnp.sum(v, axis=1, keepdims=True)   # lane reduce   -> (rows, 1)
    s = jnp.sum(s, axis=0, keepdims=True)   # sublane reduce -> (1, 1)
    return s * (1.0 / float(count))


def _output_layer_kernel(bfc_ref, x_ref, w1_ref, b1_ref, g_ref, bln_ref,
                         w2_ref, b2_ref, wfc_ref, o_ref):
    # bfc_ref : SMEM (1,)          fc bias (scalar)
    # x_ref   : VMEM (Bn, C*H, n)  batch tile, (channel,time) folded on sublanes
    # w1_ref  : VMEM (C, C*T)      [H_out==1]  or (T, C, C) [general]
    # b1_ref  : VMEM (C, 1)
    # g_ref   : VMEM (C, n)        LayerNorm gamma (transposed)
    # bln_ref : VMEM (C, n)        LayerNorm beta  (transposed)
    # w2_ref  : VMEM (C, C)
    # b2_ref  : VMEM (C, 1)
    # wfc_ref : VMEM (C, 1)
    # o_ref   : VMEM (Bn*H_out, n)
    eps = 1e-5
    Bn, CH, n = x_ref.shape
    C = w2_ref.shape[0]
    H = CH // C
    T = (w1_ref.shape[1] // C) if w1_ref.ndim == 2 else w1_ref.shape[0]
    H_out = H - T + 1

    b1 = b1_ref[...]          # (C, 1)
    gamma = g_ref[...]        # (C, n)
    beta = bln_ref[...]       # (C, n)
    w2 = w2_ref[...]          # (C, C)
    b2 = b2_ref[...]          # (C, 1)
    wfc = wfc_ref[...]        # (C, 1)
    bfc = bfc_ref[0]          # scalar

    if H_out == 1:
        w1_full = w1_ref[...]  # (C, C*T), hoisted: loaded once per grid step

    rows = []
    for bi in range(Bn):
        for ho in range(H_out):
            # ---- tconv1: Conv2d(c, c, (T, 1)), valid padding ----
            if H_out == 1:
                # window covers the whole flattened (C*T, n) slab -> one MXU matmul
                y1 = jnp.dot(w1_full, x_ref[bi],
                             preferred_element_type=jnp.float32) + b1
            else:
                acc = jnp.zeros((C, n), dtype=jnp.float32)
                for t in range(T):
                    # channel-major rows of time step ho+t (sublane-strided load)
                    x_t = x_ref[bi, pl.ds(ho + t, C, stride=H), :]
                    acc = acc + jnp.dot(w1_ref[t], x_t,
                                        preferred_element_type=jnp.float32)
                y1 = acc + b1                                     # (C, n)

            # ---- LayerNorm over the joint (n, c) slab (PyTorch eps / biased var) ----
            mu = _mean_all(y1, C * n)
            cen = y1 - mu
            var = _mean_all(cen * cen, C * n)
            x_ln = cen * jax.lax.rsqrt(var + eps) * gamma + beta  # (C, n)

            # ---- tconv2: 1x1 conv c->c on the MXU ----
            y2 = jnp.dot(w2, x_ln, preferred_element_type=jnp.float32) + b2

            # ---- fc: 1x1 conv c->1 on the VPU (M=1 MXU matmul would be wasted) ----
            rows.append(jnp.sum(y2 * wfc, axis=0, keepdims=True) + bfc)   # (1, n)

    out = rows[0] if len(rows) == 1 else jnp.concatenate(rows, axis=0)
    o_ref[...] = out.astype(o_ref.dtype)    # one dense (Bn*H_out, n) store


def output_layer_forward(x, w1, b1, gamma, beta, w2, b2, wfc, bfc,
                         *, block_batch=8, vmem_limit_bytes=64 * 1024 * 1024):
    """Pallas forward for OutputLayer.

    x:     (N, C, H, n)   NCHW input (H = time, W = n nodes)
    w1:    (C, C, T, 1)   tconv1 weight (PyTorch Conv2d layout),  b1: (C,)
    gamma: (n, C)         LayerNorm weight,                       beta: (n, C)
    w2:    (C, C, 1, 1)   tconv2 weight,                          b2: (C,)
    wfc:   (1, C, 1, 1)   fc weight,                              bfc: (1,)
    returns (N, 1, H - T + 1, n)
    """
    N, C, H, n = x.shape
    T = w1.shape[2]
    H_out = H - T + 1
    assert H_out >= 1, "temporal kernel larger than input time dimension"

    # ---- parameter layouts for the kernel (tiny host-side reshapes) ----
    if H_out == 1:
        w1_k = w1[:, :, :, 0].reshape(C, C * T)           # cols ordered ci*T + t
    else:
        w1_k = jnp.transpose(w1[:, :, :, 0], (2, 0, 1))   # (T, C_out, C_in)
    b1_k = b1.reshape(C, 1)
    g_k = jnp.transpose(gamma).reshape(C, n)
    beta_k = jnp.transpose(beta).reshape(C, n)
    w2_k = w2[:, :, 0, 0]
    b2_k = b2.reshape(C, 1)
    wfc_k = wfc.reshape(C, 1)
    bfc_k = bfc.reshape(1).astype(jnp.float32)

    # ---- batch tiling: Bn samples per grid step ----
    Bn = N if N <= block_batch else block_batch
    if Bn < N and (Bn * H_out) % 8 != 0:
        Bn = N                       # keep the output tile 8-row (sublane) aligned
    N_pad = pl.cdiv(N, Bn) * Bn
    x_flat = x.reshape(N, C * H, n)  # free reshape: fold (channel, time) on sublanes
    if N_pad != N:
        x_flat = jnp.pad(x_flat, ((0, N_pad - N), (0, 0), (0, 0)))

    grid = (N_pad // Bn,)
    out_rows = N_pad * H_out

    cost = pl.CostEstimate(
        flops=2 * N_pad * H_out * n * (C * C * T + C * C + C),
        transcendentals=N_pad * H_out,
        bytes_accessed=4 * (N_pad * C * H * n + out_rows * n
                            + int(w1_k.size) + 2 * C * n + C * C + 3 * C + 1),
    )

    out2d = pl.pallas_call(
        _output_layer_kernel,
        out_shape=jax.ShapeDtypeStruct((out_rows, n), x.dtype),
        grid_spec=pl.GridSpec(
            grid=grid,
            in_specs=[
                pl.BlockSpec(memory_space=pltpu.SMEM),                    # bfc
                pl.BlockSpec((Bn, C * H, n), lambda i: (i, 0, 0)),        # x
                pl.BlockSpec(w1_k.shape, lambda i: (0,) * w1_k.ndim),     # w1
                pl.BlockSpec((C, 1), lambda i: (0, 0)),                   # b1
                pl.BlockSpec((C, n), lambda i: (0, 0)),                   # gamma
                pl.BlockSpec((C, n), lambda i: (0, 0)),                   # beta
                pl.BlockSpec((C, C), lambda i: (0, 0)),                   # w2
                pl.BlockSpec((C, 1), lambda i: (0, 0)),                   # b2
                pl.BlockSpec((C, 1), lambda i: (0, 0)),                   # wfc
            ],
            out_specs=pl.BlockSpec((Bn * H_out, n), lambda i: (i, 0)),
        ),
        compiler_params=pltpu.CompilerParams(
            dimension_semantics=("parallel",),
            vmem_limit_bytes=vmem_limit_bytes,
        ),
        cost_estimate=cost,
    )(bfc_k, x_flat, w1_k, b1_k, g_k, beta_k, w2_k, b2_k, wfc_k)

    out = out2d.reshape(N_pad, H_out, n)[:N]
    return out[:, None, :, :]         # (N, 1, H_out, n)


def _output_layer_ref(x, w1, b1, gamma, beta, w2, b2, wfc, bfc, eps=1e-5):
    """Pure-JAX reference matching the PyTorch OutputLayer forward."""
    N, C, H, n = x.shape
    T = w1.shape[2]
    H_out = H - T + 1
    hp = jax.lax.Precision.HIGHEST
    w1_ = w1[:, :, :, 0]                                   # (C_out, C_in, T)
    y1 = jnp.stack(
        [jnp.einsum("oit,bitw->bow", w1_, x[:, :, ho:ho + T, :], precision=hp)
         for ho in range(H_out)], axis=2) + b1[None, :, None, None]
    z = jnp.transpose(y1, (0, 2, 3, 1))                    # (N, H_out, n, C)
    mu = jnp.mean(z, axis=(-2, -1), keepdims=True)
    var = jnp.mean((z - mu) ** 2, axis=(-2, -1), keepdims=True)
    zn = (z - mu) / jnp.sqrt(var + eps) * gamma[None, None] + beta[None, None]
    x_ln = jnp.transpose(zn, (0, 3, 1, 2))                 # (N, C, H_out, n)
    y2 = jnp.einsum("oi,bihw->bohw", w2[:, :, 0, 0], x_ln, precision=hp) \
        + b2[None, :, None, None]
    out = jnp.einsum("i,bihw->bhw", wfc[0, :, 0, 0], y2, precision=hp) + bfc[0]
    return out[:, None]                                    # (N, 1, H_out, n)


if __name__ == "__main__":
    key = jax.random.PRNGKey(0)
    ks = jax.random.split(key, 9)

    N, C, T, n = 2, 4, 8, 16        # batch, channels, temporal kernel, nodes
    H = T                           # OutputLayer is applied with H == T -> H_out == 1

    x = jax.random.normal(ks[0], (N, C, H, n), dtype=jnp.float32)
    w1 = jax.random.normal(ks[1], (C, C, T, 1), dtype=jnp.float32) * 0.1
    b1 = jax.random.normal(ks[2], (C,), dtype=jnp.float32) * 0.1
    gamma = 1.0 + 0.1 * jax.random.normal(ks[3], (n, C), dtype=jnp.float32)
    beta = 0.1 * jax.random.normal(ks[4], (n, C), dtype=jnp.float32)
    w2 = jax.random.normal(ks[5], (C, C, 1, 1), dtype=jnp.float32) * 0.1
    b2 = jax.random.normal(ks[6], (C,), dtype=jnp.float32) * 0.1
    wfc = jax.random.normal(ks[7], (1, C, 1, 1), dtype=jnp.float32) * 0.1
    bfc = jax.random.normal(ks[8], (1,), dtype=jnp.float32) * 0.1

    out = output_layer_forward(x, w1, b1, gamma, beta, w2, b2, wfc, bfc)
    out = jax.block_until_ready(out)

    ref = _output_layer_ref(x, w1, b1, gamma, beta, w2, b2, wfc, bfc)
    assert out.shape == (N, 1, H - T + 1, n), out.shape
    assert jnp.allclose(out, ref, atol=2e-3, rtol=2e-3), \
        float(jnp.max(jnp.abs(out - ref)))

    print("KERNEL_OK")
</pallas_src>

<mosaic_0001>
module attributes {stable_mosaic.version = 11 : i64} {
  func.func @_output_layer_kernel(%arg0: i32, %arg1: memref<1xf32, #tpu.memory_space<smem>>, %arg2: memref<2x32x16xf32, #tpu.memory_space<vmem>>, %arg3: memref<4x32xf32, #tpu.memory_space<vmem>>, %arg4: memref<4x1xf32, #tpu.memory_space<vmem>>, %arg5: memref<4x16xf32, #tpu.memory_space<vmem>>, %arg6: memref<4x16xf32, #tpu.memory_space<vmem>>, %arg7: memref<4x4xf32, #tpu.memory_space<vmem>>, %arg8: memref<4x1xf32, #tpu.memory_space<vmem>>, %arg9: memref<4x1xf32, #tpu.memory_space<vmem>>, %arg10: memref<2x16xf32, #tpu.memory_space<vmem>>) attributes {dimension_semantics = [#tpu.dimension_semantics<parallel>], iteration_bounds = array<i64: 1>, scalar_prefetch = 0 : i64, scratch_operands = 0 : i64, tpu.core_type = #tpu.core_type<tc>, window_params = [{transform_indices = @transform_0, window_bounds = array<i64: 1>}, {transform_indices = @transform_1, window_bounds = array<i64: 2, 32, 16>}, {pipeline_mode = #tpu.pipeline_mode<synchronous>, transform_indices = @transform_2, window_bounds = array<i64: 4, 32>}, {pipeline_mode = #tpu.pipeline_mode<synchronous>, transform_indices = @transform_3, window_bounds = array<i64: 4, 1>}, {pipeline_mode = #tpu.pipeline_mode<synchronous>, transform_indices = @transform_4, window_bounds = array<i64: 4, 16>}, {pipeline_mode = #tpu.pipeline_mode<synchronous>, transform_indices = @transform_5, window_bounds = array<i64: 4, 16>}, {pipeline_mode = #tpu.pipeline_mode<synchronous>, transform_indices = @transform_6, window_bounds = array<i64: 4, 4>}, {pipeline_mode = #tpu.pipeline_mode<synchronous>, transform_indices = @transform_7, window_bounds = array<i64: 4, 1>}, {pipeline_mode = #tpu.pipeline_mode<synchronous>, transform_indices = @transform_8, window_bounds = array<i64: 4, 1>}, {transform_indices = @transform_9, window_bounds = array<i64: 2, 16>}]} {
    %c0 = arith.constant 0 : index
    %c0_0 = arith.constant 0 : index
    %0 = vector.load %arg4[%c0, %c0_0] : memref<4x1xf32, #tpu.memory_space<vmem>>, vector<4x1xf32>
    %c0_1 = arith.constant 0 : index
    %c0_2 = arith.constant 0 : index
    %1 = vector.load %arg5[%c0_1, %c0_2] : memref<4x16xf32, #tpu.memory_space<vmem>>, vector<4x16xf32>
    %c0_3 = arith.constant 0 : index
    %c0_4 = arith.constant 0 : index
    %2 = vector.load %arg6[%c0_3, %c0_4] : memref<4x16xf32, #tpu.memory_space<vmem>>, vector<4x16xf32>
    %c0_5 = arith.constant 0 : index
    %c0_6 = arith.constant 0 : index
    %3 = vector.load %arg7[%c0_5, %c0_6] : memref<4x4xf32, #tpu.memory_space<vmem>>, vector<4x4xf32>
    %c0_7 = arith.constant 0 : index
    %c0_8 = arith.constant 0 : index
    %4 = vector.load %arg8[%c0_7, %c0_8] : memref<4x1xf32, #tpu.memory_space<vmem>>, vector<4x1xf32>
    %c0_9 = arith.constant 0 : index
    %c0_10 = arith.constant 0 : index
    %5 = vector.load %arg9[%c0_9, %c0_10] : memref<4x1xf32, #tpu.memory_space<vmem>>, vector<4x1xf32>
    %c0_11 = arith.constant 0 : index
    %6 = memref.load %arg1[%c0_11] : memref<1xf32, #tpu.memory_space<smem>>
    %c0_12 = arith.constant 0 : index
    %c0_13 = arith.constant 0 : index
    %7 = vector.load %arg3[%c0_12, %c0_13] : memref<4x32xf32, #tpu.memory_space<vmem>>, vector<4x32xf32>
    %c0_14 = arith.constant 0 : index
    %c0_15 = arith.constant 0 : index
    %c0_16 = arith.constant 0 : index
    %8 = vector.load %arg2[%c0_14, %c0_15, %c0_16] : memref<2x32x16xf32, #tpu.memory_space<vmem>>, vector<1x32x16xf32>
    %9 = vector.shape_cast %8 : vector<1x32x16xf32> to vector<32x16xf32>
    %cst = arith.constant dense<0.000000e+00> : vector<4x16xf32>
    %10 = tpu.matmul %7, %9, %cst {dimension_numbers = #tpu.dot_dimension_numbers<[1], [0], [0], [1], [0, 0, 1, 1], [], []>} : vector<4x32xf32>, vector<32x16xf32>, vector<4x16xf32> -> vector<4x16xf32>
    %11 = vector.broadcast %0 : vector<4x1xf32> to vector<4x16xf32>
    %12 = arith.addf %10, %11 : vector<4x16xf32>
    %cst_17 = arith.constant dense<0.000000e+00> : vector<4xf32>
    %13 = vector.multi_reduction <add>, %12, %cst_17 [1] : vector<4x16xf32> to vector<4xf32>
    %14 = vector.shape_cast %13 : vector<4xf32> to vector<4x1xf32>
    %cst_18 = arith.constant dense<0.000000e+00> : vector<1xf32>
    %15 = vector.multi_reduction <add>, %14, %cst_18 [0] : vector<4x1xf32> to vector<1xf32>
    %16 = vector.shape_cast %15 : vector<1xf32> to vector<1x1xf32>
    %cst_19 = arith.constant 1.562500e-02 : f32
    %17 = vector.broadcast %cst_19 : f32 to vector<1x1xf32>
    %18 = arith.mulf %16, %17 : vector<1x1xf32>
    %19 = vector.broadcast %18 : vector<1x1xf32> to vector<4x16xf32>
    %20 = arith.subf %12, %19 : vector<4x16xf32>
    %21 = arith.mulf %20, %20 : vector<4x16xf32>
    %cst_20 = arith.constant dense<0.000000e+00> : vector<4xf32>
    %22 = vector.multi_reduction <add>, %21, %cst_20 [1] : vector<4x16xf32> to vector<4xf32>
    %23 = vector.shape_cast %22 : vector<4xf32> to vector<4x1xf32>
    %cst_21 = arith.constant dense<0.000000e+00> : vector<1xf32>
    %24 = vector.multi_reduction <add>, %23, %cst_21 [0] : vector<4x1xf32> to vector<1xf32>
    %25 = vector.shape_cast %24 : vector<1xf32> to vector<1x1xf32>
    %cst_22 = arith.constant 1.562500e-02 : f32
    %26 = vector.broadcast %cst_22 : f32 to vector<1x1xf32>
    %27 = arith.mulf %25, %26 : vector<1x1xf32>
    %cst_23 = arith.constant 9.99999974E-6 : f32
    %28 = vector.broadcast %cst_23 : f32 to vector<1x1xf32>
    %29 = arith.addf %27, %28 : vector<1x1xf32>
    %30 = math.rsqrt %29 : vector<1x1xf32>
    %31 = vector.broadcast %30 : vector<1x1xf32> to vector<4x16xf32>
    %32 = arith.mulf %20, %31 : vector<4x16xf32>
    %33 = arith.mulf %32, %1 : vector<4x16xf32>
    %34 = arith.addf %33, %2 : vector<4x16xf32>
    %cst_24 = arith.constant dense<0.000000e+00> : vector<4x16xf32>
    %35 = tpu.matmul %3, %34, %cst_24 {dimension_numbers = #tpu.dot_dimension_numbers<[1], [0], [0], [1], [0, 0, 1, 1], [], []>} : vector<4x4xf32>, vector<4x16xf32>, vector<4x16xf32> -> vector<4x16xf32>
    %36 = vector.broadcast %4 : vector<4x1xf32> to vector<4x16xf32>
    %37 = arith.addf %35, %36 : vector<4x16xf32>
    %38 = vector.broadcast %5 : vector<4x1xf32> to vector<4x16xf32>
    %39 = arith.mulf %37, %38 : vector<4x16xf32>
    %cst_25 = arith.constant dense<0.000000e+00> : vector<16xf32>
    %40 = vector.multi_reduction <add>, %39, %cst_25 [0] : vector<4x16xf32> to vector<16xf32>
    %41 = vector.shape_cast %40 : vector<16xf32> to vector<1x16xf32>
    %42 = vector.broadcast %6 : f32 to vector<1x16xf32>
    %43 = arith.addf %41, %42 : vector<1x16xf32>
    %c1 = arith.constant 1 : index
    %c0_26 = arith.constant 0 : index
    %c0_27 = arith.constant 0 : index
    %44 = vector.load %arg2[%c1, %c0_26, %c0_27] : memref<2x32x16xf32, #tpu.memory_space<vmem>>, vector<1x32x16xf32>
    %45 = vector.shape_cast %44 : vector<1x32x16xf32> to vector<32x16xf32>
    %cst_28 = arith.constant dense<0.000000e+00> : vector<4x16xf32>
    %46 = tpu.matmul %7, %45, %cst_28 {dimension_numbers = #tpu.dot_dimension_numbers<[1], [0], [0], [1], [0, 0, 1, 1], [], []>} : vector<4x32xf32>, vector<32x16xf32>, vector<4x16xf32> -> vector<4x16xf32>
    %47 = vector.broadcast %0 : vector<4x1xf32> to vector<4x16xf32>
    %48 = arith.addf %46, %47 : vector<4x16xf32>
    %cst_29 = arith.constant dense<0.000000e+00> : vector<4xf32>
    %49 = vector.multi_reduction <add>, %48, %cst_29 [1] : vector<4x16xf32> to vector<4xf32>
    %50 = vector.shape_cast %49 : vector<4xf32> to vector<4x1xf32>
    %cst_30 = arith.constant dense<0.000000e+00> : vector<1xf32>
    %51 = vector.multi_reduction <add>, %50, %cst_30 [0] : vector<4x1xf32> to vector<1xf32>
    %52 = vector.shape_cast %51 : vector<1xf32> to vector<1x1xf32>
    %cst_31 = arith.constant 1.562500e-02 : f32
    %53 = vector.broadcast %cst_31 : f32 to vector<1x1xf32>
    %54 = arith.mulf %52, %53 : vector<1x1xf32>
    %55 = vector.broadcast %54 : vector<1x1xf32> to vector<4x16xf32>
    %56 = arith.subf %48, %55 : vector<4x16xf32>
    %57 = arith.mulf %56, %56 : vector<4x16xf32>
    %cst_32 = arith.constant dense<0.000000e+00> : vector<4xf32>
    %58 = vector.multi_reduction <add>, %57, %cst_32 [1] : vector<4x16xf32> to vector<4xf32>
    %59 = vector.shape_cast %58 : vector<4xf32> to vector<4x1xf32>
    %cst_33 = arith.constant dense<0.000000e+00> : vector<1xf32>
    %60 = vector.multi_reduction <add>, %59, %cst_33 [0] : vector<4x1xf32> to vector<1xf32>
    %61 = vector.shape_cast %60 : vector<1xf32> to vector<1x1xf32>
    %cst_34 = arith.constant 1.562500e-02 : f32
    %62 = vector.broadcast %cst_34 : f32 to vector<1x1xf32>
    %63 = arith.mulf %61, %62 : vector<1x1xf32>
    %cst_35 = arith.constant 9.99999974E-6 : f32
    %64 = vector.broadcast %cst_35 : f32 to vector<1x1xf32>
    %65 = arith.addf %63, %64 : vector<1x1xf32>
    %66 = math.rsqrt %65 : vector<1x1xf32>
    %67 = vector.broadcast %66 : vector<1x1xf32> to vector<4x16xf32>
    %68 = arith.mulf %56, %67 : vector<4x16xf32>
    %69 = arith.mulf %68, %1 : vector<4x16xf32>
    %70 = arith.addf %69, %2 : vector<4x16xf32>
    %cst_36 = arith.constant dense<0.000000e+00> : vector<4x16xf32>
    %71 = tpu.matmul %3, %70, %cst_36 {dimension_numbers = #tpu.dot_dimension_numbers<[1], [0], [0], [1], [0, 0, 1, 1], [], []>} : vector<4x4xf32>, vector<4x16xf32>, vector<4x16xf32> -> vector<4x16xf32>
    %72 = vector.broadcast %4 : vector<4x1xf32> to vector<4x16xf32>
    %73 = arith.addf %71, %72 : vector<4x16xf32>
    %74 = vector.broadcast %5 : vector<4x1xf32> to vector<4x16xf32>
    %75 = arith.mulf %73, %74 : vector<4x16xf32>
    %cst_37 = arith.constant dense<0.000000e+00> : vector<16xf32>
    %76 = vector.multi_reduction <add>, %75, %cst_37 [0] : vector<4x16xf32> to vector<16xf32>
    %77 = vector.shape_cast %76 : vector<16xf32> to vector<1x16xf32>
    %78 = vector.broadcast %6 : f32 to vector<1x16xf32>
    %79 = arith.addf %77, %78 : vector<1x16xf32>
    %80 = tpu.concatenate %43, %79 in 0 : vector<1x16xf32>, vector<1x16xf32> -> vector<2x16xf32>
    %c0_38 = arith.constant 0 : index
    %c0_39 = arith.constant 0 : index
    %81 = vector.load %arg10[%c0_38, %c0_39] : memref<2x16xf32, #tpu.memory_space<vmem>>, vector<2x16xf32>
    tpu.vector_store %arg10[%c0_38, %c0_39], %80 {strides = array<i32>} : memref<2x16xf32, #tpu.memory_space<vmem>>, vector<2x16xf32>,
    return
  }
  func.func @transform_0(%arg0: i32) -> i32 {
    %c0_i32 = arith.constant 0 : i32
    %c0_i32_0 = arith.constant 0 : i32
    return %c0_i32 : i32
  }
  func.func @transform_1(%arg0: i32) -> (i32, i32, i32) {
    %c0_i32 = arith.constant 0 : i32
    %c0_i32_0 = arith.constant 0 : i32
    %c0_i32_1 = arith.constant 0 : i32
    return %arg0, %c0_i32, %c0_i32_0 : i32, i32, i32
  }
  func.func @transform_2(%arg0: i32) -> (i32, i32) {
    %c0_i32 = arith.constant 0 : i32
    %c0_i32_0 = arith.constant 0 : i32
    %c0_i32_1 = arith.constant 0 : i32
    return %c0_i32, %c0_i32_0 : i32, i32
  }
  func.func @transform_3(%arg0: i32) -> (i32, i32) {
    %c0_i32 = arith.constant 0 : i32
    %c0_i32_0 = arith.constant 0 : i32
    %c0_i32_1 = arith.constant 0 : i32
    return %c0_i32, %c0_i32_0 : i32, i32
  }
  func.func @transform_4(%arg0: i32) -> (i32, i32) {
    %c0_i32 = arith.constant 0 : i32
    %c0_i32_0 = arith.constant 0 : i32
    %c0_i32_1 = arith.constant 0 : i32
    return %c0_i32, %c0_i32_0 : i32, i32
  }
  func.func @transform_5(%arg0: i32) -> (i32, i32) {
    %c0_i32 = arith.constant 0 : i32
    %c0_i32_0 = arith.constant 0 : i32
    %c0_i32_1 = arith.constant 0 : i32
    return %c0_i32, %c0_i32_0 : i32, i32
  }
  func.func @transform_6(%arg0: i32) -> (i32, i32) {
    %c0_i32 = arith.constant 0 : i32
    %c0_i32_0 = arith.constant 0 : i32
    %c0_i32_1 = arith.constant 0 : i32
    return %c0_i32, %c0_i32_0 : i32, i32
  }
  func.func @transform_7(%arg0: i32) -> (i32, i32) {
    %c0_i32 = arith.constant 0 : i32
    %c0_i32_0 = arith.constant 0 : i32
    %c0_i32_1 = arith.constant 0 : i32
    return %c0_i32, %c0_i32_0 : i32, i32
  }
  func.func @transform_8(%arg0: i32) -> (i32, i32) {
    %c0_i32 = arith.constant 0 : i32
    %c0_i32_0 = arith.constant 0 : i32
    %c0_i32_1 = arith.constant 0 : i32
    return %c0_i32, %c0_i32_0 : i32, i32
  }
  func.func @transform_9(%arg0: i32) -> (i32, i32) {
    %c0_i32 = arith.constant 0 : i32
    %c0_i32_0 = arith.constant 0 : i32
    return %arg0, %c0_i32 : i32, i32
  }
}

</mosaic_0001>

<bundles_post_ra>
// kernel: tpu_custom_call.1
= control target key start
LH: loop header
LB: loop body
LE: loop exit
PB: predicated region body
PF: predicated region fallthrough
CT: control target
= control target key end

     0   :  { %v545_v1 = vmov 0.0   ;;  %vm546_vm0 = vmmov 0   ;;  %v547_v4 = vmov 0   ;;  %s688_s0 = inlined_call_operand.<no memory space> [shape: f32[1], index: 0, kind: input, shape index: {}]   ;;  %s689_s1 = inlined_call_operand.vmem [shape: f32[2,32,16], index: 1, kind: input, shape index: {}]   ;;  %s690_s2 = inlined_call_operand.vmem [shape: f32[4,32], index: 2, kind: input, shape index: {}]   ;;  %s691_s3 = inlined_call_operand.vmem [shape: f32[4,1], index: 3, kind: input, shape index: {}]   ;;  %s692_s4 = inlined_call_operand.vmem [shape: f32[4,16], index: 4, kind: input, shape index: {}]   ;;  %s693_s5 = inlined_call_operand.vmem [shape: f32[4,16], index: 5, kind: input, shape index: {}]   ;;  %s694_s6 = inlined_call_operand.vmem [shape: f32[4,4], index: 6, kind: input, shape index: {}]   ;;  %s695_s7 = inlined_call_operand.vmem [shape: f32[4,1], index: 7, kind: input, shape index: {}]   ;;  %s696_s8 = inlined_call_operand.vmem [shape: f32[4,1], index: 8, kind: input, shape index: {}]   ;;  %s697_s9 = inlined_call_operand.hbm [shape: f32[2,16], index: 9, kind: output, shape index: {}]  }
   0x1   :  { %v45_v0 = vld [vmem:[%s689_s1 + $0x18] sm:$0xff]  ;;  %481 = vmatprep.subr.mxu0 %v545_v1  ;;  %v44_v2 = vld [vmem:[%s689_s1 + $0x10] sm:$0xff]  ;;  %489 = vmatprep.mubr.msk.f32.mxu0 %vm546_vm0, %v545_v1  ;;  %v34_v3 = vld [vmem:[%s691_s3] sm:$0xf] }
   0x2   :  { %482 = vmatpush3.msra.mxu0 %v45_v0  ;;  %517 = vset.pattern.permute.xlu0 %v547_v4 }
   0x3   :  { %15 = vsyncpa [#allocation4], 0  ;;  %483 = vmatprep.subr.mxu0 %v545_v1  ;;  %v43_v5 = vld [vmem:[%s689_s1 + $0x8] sm:$0xff]  ;;  %48 = vperm.xlu0 %517, %v34_v3   ;;  %v42_v6 = vld [vmem:[%s689_s1] sm:$0xff]  ;;  %vm51_vm1 = vcmask 261120   ;;  %vm125_vm2 = vcmask 125952  }
   0x4   :  { %484 = vmatpush3.msra.mxu0 %v44_v2  ;;  %492 = vmatprep.subr.mxu1 %v545_v1  ;;  %v625_v7 = vld [vmem:[%s690_s2] sm:$0xf]  ;;  %vm129_vm3 = vcmask 1043456   ;;  %vm161_vm4 = vcmask 31744   ;;  %v463_v42 = vld [vmem:[%s689_s1 + $0x38] sm:$0xff]  ;;  %v462_v43 = vld [vmem:[%s689_s1 + $0x30] sm:$0xff] }
   0x5   :  { %485 = vmatprep.subr.mxu0 %v545_v1  ;;  %494 = vmatprep.mubr.msk.f32.mxu1 %vm546_vm0, %v545_v1  ;;  %v35_v36 = vld [vmem:[%s692_s4] sm:$0xf]  ;;  %v461_v44 = vld [vmem:[%s689_s1 + $0x28] sm:$0xff]  ;;  %s548_s12 = smov [#allocation3]   ;;  %vm439_vm5 = vcmask 1040384   ;;  %vm441_vm6 = vcmask 123904  }
   0x6   :  { %486 = vmatpush3.msra.mxu0 %v43_v5  ;;  %518 = vset.pattern.permute.xlu1 %v547_v4  ;;  %v36_v38 = vld [vmem:[%s693_s5] sm:$0xf]  ;;  %s449_s13 = sshll.u32 %s548_s12, 4  ;;  %s450_s13 = int_to_ptr.vmem [resolvable:$true] %s449_s13 }
   0x7   :  { %487 = vmatprep.subr.mxu0 %v545_v1  ;;  %v37_v41 = vld [vmem:[%s694_s6] sm:$0xf]  ;;  %s523_s14 = scalar_lea.vmem %s450_s13, 32  ;;  %p528_p1 = scmp.lt.s32.totalorder %s450_s13, %s450_s13 }
   0x8   :  { %488 = vmatpush3.msra.mxu0 %v42_v6  ;;  %v460_v45 = vld [vmem:[%s689_s1 + $0x20] sm:$0xff]  ;;  %p524_p0 = scmp.ne.s32.totalorder %s450_s13, %s523_s14  ;;  %p529_p2 = scmp.lt.s32.totalorder %s523_s14, %s523_s14 }
   0x9   :  { %490 = vmatmul.mubr.msk.f32.vlgmr.msra.gmra.mxu0 %vm51_vm1, %v625_v7  ;;  %508 = vmatprep.subr.mxu0 %v545_v1  ;;  %v38_v0 = vld [vmem:[%s695_s7] sm:$0xf] }
   0xa   :  { %510 = vmatprep.mubr.msk.f32.mxu0 %vm546_vm0, %v545_v1  ;;  %p530_p3 = por %p529_p2, %p528_p1 }
   0xc   :  { %p531_p4 = pnand %p530_p3, %p524_p0 }
  0x7e   :  { %v49_v8 = vpop.permute.xlu0 %48 }
  0xc9   :  { %v121_v9 = vpop.f32.mrf.mxu0 }
  0xca   :  { %v122_v10 = vadd.f32 %v121_v9, %v49_v8 }
  0xcb   :  { %v491_v11 = vpop.f32.mrf.mxu0 }
  0xcc   :  { %v126_v12 = vsel %vm125_vm2, %v122_v10, 0.0 }
  0xcd   :  { %127 = vadd.xlane.f32.xlu0 %v126_v12 }
 0x156   :  { %v128_v13 = vpop.xlane.xlu0 %127 }
 0x157   :  { %v130_v14 = vsel %vm129_vm3, %v128_v13, 0.0 }
 0x158   :  { %v131_v15 = vrot.slane %v130_v14, 4 }
 0x15a   :  { %v132_v16 = vadd.f32 %v131_v15, %v130_v14 }
 0x15c   :  { %v133_v17 = vrot.slane %v132_v16, 2 }
 0x15e   :  { %v134_v18 = vadd.f32 %v133_v17, %v132_v16 }
 0x160   :  { %v135_v19 = vrot.slane %v134_v18, 1 }
 0x162   :  { %v136_v20 = vadd.f32 %v135_v19, %v134_v18 }
 0x164   :  { %v137_v21 = vmul.f32 0.015625, %v136_v20 }
 0x166   :  { %v138_v22 = vsub.f32 %v122_v10, %v137_v21 }
 0x168   :  { %v139_v23 = vmul.f32 %v138_v22, %v138_v22 }
 0x16a   :  { %v140_v24 = vsel %vm125_vm2, %v139_v23, 0.0 }
 0x16b   :  { %141 = vadd.xlane.f32.xlu1 %v140_v24 }
 0x1f4   :  { %v142_v25 = vpop.xlane.xlu1 %141 }
 0x1f5   :  { %v143_v26 = vsel %vm129_vm3, %v142_v25, 0.0 }
 0x1f6   :  { %v144_v27 = vrot.slane %v143_v26, 4 }
 0x1f8   :  { %v145_v28 = vadd.f32 %v144_v27, %v143_v26 }
 0x1fa   :  { %v146_v29 = vrot.slane %v145_v28, 2 }
 0x1fc   :  { %v147_v30 = vadd.f32 %v146_v29, %v145_v28 }
 0x1fe   :  { %v148_v31 = vrot.slane %v147_v30, 1 }
 0x200   :  { %v149_v32 = vadd.f32 %v148_v31, %v147_v30 }
 0x202   :  { %v150_v33 = vmul.f32 0.015625, %v149_v32 }
 0x204   :  { %v151_v34 = vadd.f32 1e-05, %v150_v33 }
 0x206   :  { %519 = vrsqrt.f32 %v151_v34 }
 0x213   :  { %v520_v35 = vpop.eup %519 }
 0x214   :  { %v153_v37 = vmul.f32 %v520_v35, %v138_v22 }
 0x216   :  { %v154_v39 = vmul.f32 %v153_v37, %v35_v36  ;;  %v251_v37 = vstv %s688_s0 }
 0x218   :  { %v155_v40 = vadd.f32 %v154_v39, %v36_v38 }
 0x21a   :  { %493 = vmatpush3.msk.msra.mxu1 %vm129_vm3, %v155_v40 }
 0x21b   :  { %495 = vmatmul.mubr.msk.f32.vlgmr.msra.gmra.mxu1 %vm161_vm4, %v37_v41  ;;  %497 = vmatprep.subr.mxu1 %v545_v1 }
 0x21c   :  { %498 = vmatpush3.msra.mxu1 %v463_v42  ;;  %505 = vmatprep.mubr.msk.f32.mxu1 %vm546_vm0, %v545_v1 }
 0x21d   :  { %499 = vmatprep.subr.mxu1 %v545_v1 }
 0x21e   :  { %500 = vmatpush3.msra.mxu1 %v462_v43 }
 0x21f   :  { %501 = vmatprep.subr.mxu1 %v545_v1 }
 0x220   :  { %502 = vmatpush3.msra.mxu1 %v461_v44 }
 0x221   :  { %503 = vmatprep.subr.mxu1 %v545_v1  ;;  %v39_v1 = vld [vmem:[%s696_s8] sm:$0xf] }
 0x222   :  { %504 = vmatpush3.msra.mxu1 %v460_v45 }
 0x223   :  { %506 = vmatmul.mubr.msk.f32.vlgmr.msra.gmra.mxu1 %vm51_vm1, %v625_v7 }
 0x2db   :  { %v234_v46 = vpop.f32.mrf.mxu1 }
 0x2dd   :  { %v496_v47 = vpop.f32.mrf.mxu1 }
 0x2e3   :  { %v324_v48 = vpop.f32.mrf.mxu1 }
 0x2e4   :  { %v325_v49 = vadd.f32 %v324_v48, %v49_v8 }
 0x2e5   :  { %v507_v50 = vpop.f32.mrf.mxu1 }
 0x2e6   :  { %v328_v51 = vsel %vm125_vm2, %v325_v49, 0.0 }
 0x2e7   :  { %329 = vadd.xlane.f32.xlu1 %v328_v51 }
 0x370   :  { %v330_v52 = vpop.xlane.xlu1 %329 }
 0x371   :  { %v331_v53 = vsel %vm129_vm3, %v330_v52, 0.0 }
 0x372   :  { %v332_v54 = vrot.slane %v331_v53, 4 }
 0x374   :  { %v333_v55 = vadd.f32 %v332_v54, %v331_v53 }
 0x376   :  { %v334_v56 = vrot.slane %v333_v55, 2 }
 0x378   :  { %v335_v57 = vadd.f32 %v334_v56, %v333_v55 }
 0x37a   :  { %v336_v58 = vrot.slane %v335_v57, 1 }
 0x37c   :  { %v337_v59 = vadd.f32 %v336_v58, %v335_v57 }
 0x37e   :  { %v338_v60 = vmul.f32 0.015625, %v337_v59 }
 0x380   :  { %v339_v61 = vsub.f32 %v325_v49, %v338_v60 }
 0x382   :  { %v340_v62 = vmul.f32 %v339_v61, %v339_v61 }
 0x384   :  { %v341_v63 = vsel %vm125_vm2, %v340_v62, 0.0 }
 0x385   :  { %342 = vadd.xlane.f32.xlu1 %v341_v63 }
 0x396   :  { %158 = vperm.xlu1 %518, %v38_v0  }
 0x39a   :  { %240 = vperm.xlu1 %518, %v39_v1  }
 0x40e   :  { %v343_v2 = vpop.xlane.xlu1 %342 }
 0x40f   :  { %v344_v3 = vsel %vm129_vm3, %v343_v2, 0.0 }
 0x410   :  { %v345_v4 = vrot.slane %v344_v3, 4 }
 0x412   :  { %v346_v5 = vadd.f32 %v345_v4, %v344_v3  ;;  %v159_v16 = vpop.permute.xlu1 %158 }
 0x413   :  { %v235_v18 = vadd.f32 %v234_v46, %v159_v16 }
 0x414   :  { %v347_v6 = vrot.slane %v346_v5, 2 }
 0x416   :  { %v348_v7 = vadd.f32 %v347_v6, %v346_v5  ;;  %v241_v17 = vpop.permute.xlu1 %240 }
 0x417   :  { %v243_v19 = vmul.f32 %v241_v17, %v235_v18 }
 0x418   :  { %v349_v8 = vrot.slane %v348_v7, 1 }
 0x419   :  { %v244_v20 = vsel %vm125_vm2, %v243_v19, 0.0 }
 0x41a   :  { %v350_v9 = vadd.f32 %v349_v8, %v348_v7  ;;  %v245_v21 = vrot.slane %v244_v20, 4 }
 0x41c   :  { %v351_v10 = vmul.f32 0.015625, %v350_v9  ;;  %v246_v22 = vadd.f32 %v245_v21, %v244_v20 }
 0x41e   :  { %v352_v11 = vadd.f32 1e-05, %v351_v10  ;;  %v247_v25 = vrot.slane %v246_v22, 2 }
 0x420   :  { %521 = vrsqrt.f32 %v352_v11  ;;  %v248_v29 = vadd.f32 %v247_v25, %v246_v22 }
 0x422   :  { %v249_v32 = vrot.slane %v248_v29, 1 }
 0x424   :  { %v250_v35 = vadd.f32 %v249_v32, %v248_v29 }
 0x426   :  { %v252_v39 = vadd.f32 %v251_v37, %v250_v35 }
 0x42d   :  { %v522_v12 = vpop.eup %521 }
 0x42e   :  { %v354_v13 = vmul.f32 %v522_v12, %v339_v61 }
 0x430   :  { %v355_v14 = vmul.f32 %v354_v13, %v35_v36 }
 0x432   :  { %v356_v15 = vadd.f32 %v355_v14, %v36_v38 }
 0x434   :  { %509 = vmatpush3.msk.msra.mxu0 %vm129_vm3, %v356_v15 }
 0x435   :  { %511 = vmatmul.mubr.msk.f32.vlgmr.msra.gmra.mxu0 %vm161_vm4, %v37_v41 }
 0x4f5   :  { %v426_v23 = vpop.f32.mrf.mxu0 }
 0x4f6   :  { %v427_v24 = vadd.f32 %v426_v23, %v159_v16 }
 0x4f7   :  { %v512_v26 = vpop.f32.mrf.mxu0 }
 0x4f8   :  { %v430_v27 = vmul.f32 %v427_v24, %v241_v17 }
 0x4fa   :  { %v431_v28 = vsel %vm125_vm2, %v430_v27, 0.0 }
 0x4fb   :  { %v432_v30 = vrot.slane %v431_v28, 4 }
 0x4fd   :  { %v433_v31 = vadd.f32 %v432_v30, %v431_v28 }
 0x4ff   :  { %v434_v33 = vrot.slane %v433_v31, 2 }
 0x501   :  { %v435_v34 = vadd.f32 %v434_v33, %v433_v31 }
 0x503   :  { %v436_v36 = vrot.slane %v435_v34, 1 }
 0x505   :  { %v437_v38 = vadd.f32 %v436_v36, %v435_v34 }
 0x507   :  { %v438_v40 = vadd.f32 %v437_v38, %v251_v37 }
 0x509   :  { %v440_v41 = vsel %vm439_vm5, %v252_v39, %v438_v40 }
 0x50a   :  { %442 = vst.msk [vmem:[#allocation3] sm:$0x3] %vm441_vm6, %v440_v41 }
 0x50b   :  { %534 = shalt.err (!%p531_p4)
}
 0x50c   :  { %452 = dma.vmem_to_hbm [thread:$0]  %s450_s13, 32, %s697_s9, [#allocation4]  }
 0x50d   :  { %543 = dma.done.wait [#allocation4], 32  }
 0x50e   :  { %544 = vsyncadd [#allocation4], 4294967264 }
 0x50f   :  { %456 = vsyncpa [#allocation4], 1 }

</bundles_post_ra>
